<compile_context>
chip_gen: v7x
topology: tpu7x:2x2x1
jax: 0.10.0
libtpu: 0.0.40
codegen_flags: <defaults>
</compile_context>

<pallas_src>
import jax
import jax.numpy as jnp
from jax.experimental import pallas as pl
from jax.experimental.pallas import tpu as pltpu

_PAD = 128       # every hidden width zero-padded to 128 lanes
_WROWS = 144     # 128 weight rows + 1 bias row, rounded to a multiple of 16 (bf16 tile)
_N_LAYERS = 4


def _round_up(v, m):
    return -(-v // m) * m


def _make_kernel(sd_pad):
    """Fused 4-layer MLP kernel over one (TB, sd_pad) batch tile."""

    def kernel(x_ref, p_ref, o_ref):
        # x_ref: (TB, sd_pad) f32   p_ref: (4, 144, 128) bf16   o_ref: (TB, 128) f32
        h = x_ref[...].astype(jnp.bfloat16)

        # Layer 1: contract over the sd_pad (tile-aligned, zero-padded) rows.
        w = p_ref[0, :sd_pad, :]                          # (sd_pad, 128) bf16
        b = p_ref[0, 128:129, :].astype(jnp.float32)      # (1, 128) f32
        h = jnp.maximum(
            jnp.dot(h, w, preferred_element_type=jnp.float32) + b, 0.0)

        # Layers 2 and 3: hidden widths zero-padded to 128, so K = 128 is exact.
        for l in (1, 2):
            w = p_ref[l, :128, :]                          # (128, 128) bf16
            b = p_ref[l, 128:129, :].astype(jnp.float32)   # (1, 128)
            h = jnp.maximum(
                jnp.dot(h.astype(jnp.bfloat16), w,
                        preferred_element_type=jnp.float32) + b, 0.0)

        # Layer 4: logits, no activation.  Store the full 128-lane padded tile
        # (lane-dense, unmasked vst); the wrapper slices to n_actions.
        w = p_ref[3, :128, :]
        b = p_ref[3, 128:129, :].astype(jnp.float32)
        h = jnp.dot(h.astype(jnp.bfloat16), w,
                    preferred_element_type=jnp.float32) + b

        o_ref[...] = h.astype(o_ref.dtype)

    return kernel


def pack_params(params):
    """Pack the 4 (W, b) pairs into one zero-padded (4, 144, 128) bf16 buffer.

    Slot l: rows 0..in-1 / cols 0..out-1 hold W_l, row 128 holds b_l.  All other
    entries are zero, which keeps the lane-padded matmuls numerically exact
    (up to bf16 quantization of the real values).
    """
    p = jnp.zeros((_N_LAYERS, _WROWS, _PAD), jnp.float32)
    for l in range(_N_LAYERS):
        w = jnp.asarray(params[f"w{l + 1}"], jnp.float32)
        b = jnp.asarray(params[f"b{l + 1}"], jnp.float32).reshape(-1)
        assert w.shape[0] <= 128 and w.shape[1] <= _PAD and b.shape[0] <= _PAD
        p = p.at[l, : w.shape[0], : w.shape[1]].set(w)
        p = p.at[l, 128, : b.shape[0]].set(b)
    return p.astype(jnp.bfloat16)


def cart_pole_mlp_pallas(x, packed_params, n_actions, block_b=4096):
    """x: (B, state_dim) f32; packed_params: (4, 144, 128) bf16 from pack_params."""
    B, state_dim = x.shape
    assert state_dim <= 128 and n_actions <= _PAD

    # Pad the feature axis to a bf16-tile-aligned contraction width (>= 16).
    sd_pad = _round_up(max(state_dim, 16), 16)

    # Batch tiling: tb is a multiple of 8 sublanes; when B allows, split into
    # an even number (>= 2) of grid steps so v7x can use both TensorCores.
    if B < 16:
        tb = 8
        n_steps = 1
    else:
        n_steps = max(2, pl.cdiv(B, block_b))
        if n_steps % 2:
            n_steps += 1
        tb = _round_up(pl.cdiv(B, n_steps), 8)
    b_pad = n_steps * tb

    if b_pad != B or sd_pad != state_dim:
        x = jnp.pad(x, ((0, b_pad - B), (0, sd_pad - state_dim)))
    grid = (n_steps,)

    # Explicit VMEM budget: x & out tiles (lanes padded to 128 -> tb*512 B each)
    # double-buffered, bf16 params double-buffered, f32 intermediates + slack.
    tile_bytes = tb * _PAD * 4
    vmem_limit = 4 * tile_bytes                         # x + out, double-buffered
    vmem_limit += 2 * (_N_LAYERS * _WROWS * _PAD * 2)   # params (bf16)
    vmem_limit += 4 * tile_bytes                        # chained-dot intermediates
    vmem_limit += 2 * 1024 * 1024                       # slack
    vmem_limit = int(min(vmem_limit, 96 * 1024 * 1024))

    flops = 2 * b_pad * _PAD * (sd_pad + 3 * _PAD)
    bytes_accessed = b_pad * sd_pad * 4 + b_pad * _PAD * 4 \
        + _N_LAYERS * _WROWS * _PAD * 2

    out = pl.pallas_call(
        _make_kernel(sd_pad),
        out_shape=jax.ShapeDtypeStruct((b_pad, _PAD), x.dtype),
        grid_spec=pltpu.PrefetchScalarGridSpec(
            num_scalar_prefetch=0,
            grid=grid,
            in_specs=[
                # Batch-tiled activations stream through the pipeline.
                pl.BlockSpec((tb, sd_pad), lambda i: (i, 0)),
                # Constant block index -> params DMA'd once, VMEM-resident
                # across the whole grid.
                pl.BlockSpec((_N_LAYERS, _WROWS, _PAD), lambda i: (0, 0, 0)),
            ],
            # Lane-dense 128-wide output tile (unmasked stores).
            out_specs=pl.BlockSpec((tb, _PAD), lambda i: (i, 0)),
        ),
        compiler_params=pltpu.CompilerParams(
            # Batch tiles are independent -> shard across both v7x TensorCores.
            dimension_semantics=("parallel",),
            vmem_limit_bytes=vmem_limit,
        ),
        cost_estimate=pl.CostEstimate(
            flops=flops, transcendentals=0, bytes_accessed=bytes_accessed),
    )(x, packed_params)
    return out[:B, :n_actions]


def init_params(key, state_dim, n_actions):
    """Deterministic init mimicking nn.Linear's uniform(-1/sqrt(in), 1/sqrt(in))."""
    dims = [(state_dim, 32), (32, 60), (60, 32), (32, n_actions)]
    params = {}
    for i, (fan_in, fan_out) in enumerate(dims, start=1):
        key, kw, kb = jax.random.split(key, 3)
        bound = 1.0 / jnp.sqrt(float(fan_in))
        params[f"w{i}"] = jax.random.uniform(
            kw, (fan_in, fan_out), jnp.float32, -bound, bound)
        params[f"b{i}"] = jax.random.uniform(
            kb, (1, fan_out), jnp.float32, -bound, bound)
    return params


def reference_mlp(x, params):
    h = jnp.maximum(x @ params["w1"] + params["b1"], 0.0)
    h = jnp.maximum(h @ params["w2"] + params["b2"], 0.0)
    h = jnp.maximum(h @ params["w3"] + params["b3"], 0.0)
    return h @ params["w4"] + params["b4"]


if __name__ == "__main__":
    state_dim = 4    # CartPole observation dim
    n_actions = 2    # CartPole action count
    batch = 8

    key = jax.random.PRNGKey(0)
    key, kx = jax.random.split(key)
    x = jax.random.normal(kx, (batch, state_dim), jnp.float32)
    params = init_params(key, state_dim, n_actions)
    packed = pack_params(params)   # pack once (bf16), reuse across calls

    fwd = jax.jit(lambda xx, pp: cart_pole_mlp_pallas(xx, pp, n_actions))
    out = jax.block_until_ready(fwd(x, packed))

    ref = reference_mlp(x, params)
    assert out.shape == (batch, n_actions)
    # bf16 MXU operands -> relaxed tolerance vs the f32 reference.
    assert jnp.allclose(out, ref, atol=5e-2, rtol=5e-2), (out, ref)

    # Exercise the multi-tile / remainder-padding / even-grid path.
    kx2 = jax.random.PRNGKey(1)
    x2 = jax.random.normal(kx2, (300, state_dim), jnp.float32)  # grid=(4,), tb=80
    out2 = jax.block_until_ready(
        cart_pole_mlp_pallas(x2, packed, n_actions, block_b=128))
    ref2 = reference_mlp(x2, params)
    assert out2.shape == (300, n_actions)
    assert jnp.allclose(out2, ref2, atol=5e-2, rtol=5e-2)

    print("KERNEL_OK")
</pallas_src>

<mosaic_0001>
module attributes {stable_mosaic.version = 11 : i64} {
  func.func @kernel(%arg0: i32, %arg1: memref<8x16xf32, #tpu.memory_space<vmem>>, %arg2: memref<4x144x128xbf16, #tpu.memory_space<vmem>>, %arg3: memref<8x128xf32, #tpu.memory_space<vmem>>) attributes {dimension_semantics = [#tpu.dimension_semantics<parallel>], iteration_bounds = array<i64: 1>, scalar_prefetch = 0 : i64, scratch_operands = 0 : i64, tpu.core_type = #tpu.core_type<tc>, window_params = [{transform_indices = @transform_0, window_bounds = array<i64: 8, 16>}, {pipeline_mode = #tpu.pipeline_mode<synchronous>, transform_indices = @transform_1, window_bounds = array<i64: 4, 144, 128>}, {transform_indices = @transform_2, window_bounds = array<i64: 8, 128>}]} {
    %c0 = arith.constant 0 : index
    %c0_0 = arith.constant 0 : index
    %0 = vector.load %arg1[%c0, %c0_0] : memref<8x16xf32, #tpu.memory_space<vmem>>, vector<8x16xf32>
    %1 = arith.truncf %0 : vector<8x16xf32> to vector<8x16xbf16>
    %c0_1 = arith.constant 0 : index
    %c0_2 = arith.constant 0 : index
    %c0_3 = arith.constant 0 : index
    %2 = vector.load %arg2[%c0_1, %c0_2, %c0_3] : memref<4x144x128xbf16, #tpu.memory_space<vmem>>, vector<1x16x128xbf16>
    %3 = vector.shape_cast %2 : vector<1x16x128xbf16> to vector<16x128xbf16>
    %c0_4 = arith.constant 0 : index
    %c128 = arith.constant 128 : index
    %c0_5 = arith.constant 0 : index
    %4 = vector.load %arg2[%c0_4, %c128, %c0_5] : memref<4x144x128xbf16, #tpu.memory_space<vmem>>, vector<1x1x128xbf16>
    %5 = vector.shape_cast %4 : vector<1x1x128xbf16> to vector<1x128xbf16>
    %6 = arith.extf %5 : vector<1x128xbf16> to vector<1x128xf32>
    %cst = arith.constant dense<0.000000e+00> : vector<8x128xf32>
    %7 = tpu.matmul %1, %3, %cst {dimension_numbers = #tpu.dot_dimension_numbers<[1], [0], [0], [1], [0, 0, 1, 1], [], []>} : vector<8x16xbf16>, vector<16x128xbf16>, vector<8x128xf32> -> vector<8x128xf32>
    %8 = vector.broadcast %6 : vector<1x128xf32> to vector<8x128xf32>
    %9 = arith.addf %7, %8 : vector<8x128xf32>
    %cst_6 = arith.constant 0.000000e+00 : f32
    %10 = vector.broadcast %cst_6 : f32 to vector<8x128xf32>
    %11 = arith.maximumf %9, %10 : vector<8x128xf32>
    %c1 = arith.constant 1 : index
    %c0_7 = arith.constant 0 : index
    %c0_8 = arith.constant 0 : index
    %12 = vector.load %arg2[%c1, %c0_7, %c0_8] : memref<4x144x128xbf16, #tpu.memory_space<vmem>>, vector<1x128x128xbf16>
    %13 = vector.shape_cast %12 : vector<1x128x128xbf16> to vector<128x128xbf16>
    %c1_9 = arith.constant 1 : index
    %c128_10 = arith.constant 128 : index
    %c0_11 = arith.constant 0 : index
    %14 = vector.load %arg2[%c1_9, %c128_10, %c0_11] : memref<4x144x128xbf16, #tpu.memory_space<vmem>>, vector<1x1x128xbf16>
    %15 = vector.shape_cast %14 : vector<1x1x128xbf16> to vector<1x128xbf16>
    %16 = arith.extf %15 : vector<1x128xbf16> to vector<1x128xf32>
    %17 = arith.truncf %11 : vector<8x128xf32> to vector<8x128xbf16>
    %cst_12 = arith.constant dense<0.000000e+00> : vector<8x128xf32>
    %18 = tpu.matmul %17, %13, %cst_12 {dimension_numbers = #tpu.dot_dimension_numbers<[1], [0], [0], [1], [0, 0, 1, 1], [], []>} : vector<8x128xbf16>, vector<128x128xbf16>, vector<8x128xf32> -> vector<8x128xf32>
    %19 = vector.broadcast %16 : vector<1x128xf32> to vector<8x128xf32>
    %20 = arith.addf %18, %19 : vector<8x128xf32>
    %cst_13 = arith.constant 0.000000e+00 : f32
    %21 = vector.broadcast %cst_13 : f32 to vector<8x128xf32>
    %22 = arith.maximumf %20, %21 : vector<8x128xf32>
    %c2 = arith.constant 2 : index
    %c0_14 = arith.constant 0 : index
    %c0_15 = arith.constant 0 : index
    %23 = vector.load %arg2[%c2, %c0_14, %c0_15] : memref<4x144x128xbf16, #tpu.memory_space<vmem>>, vector<1x128x128xbf16>
    %24 = vector.shape_cast %23 : vector<1x128x128xbf16> to vector<128x128xbf16>
    %c2_16 = arith.constant 2 : index
    %c128_17 = arith.constant 128 : index
    %c0_18 = arith.constant 0 : index
    %25 = vector.load %arg2[%c2_16, %c128_17, %c0_18] : memref<4x144x128xbf16, #tpu.memory_space<vmem>>, vector<1x1x128xbf16>
    %26 = vector.shape_cast %25 : vector<1x1x128xbf16> to vector<1x128xbf16>
    %27 = arith.extf %26 : vector<1x128xbf16> to vector<1x128xf32>
    %28 = arith.truncf %22 : vector<8x128xf32> to vector<8x128xbf16>
    %cst_19 = arith.constant dense<0.000000e+00> : vector<8x128xf32>
    %29 = tpu.matmul %28, %24, %cst_19 {dimension_numbers = #tpu.dot_dimension_numbers<[1], [0], [0], [1], [0, 0, 1, 1], [], []>} : vector<8x128xbf16>, vector<128x128xbf16>, vector<8x128xf32> -> vector<8x128xf32>
    %30 = vector.broadcast %27 : vector<1x128xf32> to vector<8x128xf32>
    %31 = arith.addf %29, %30 : vector<8x128xf32>
    %cst_20 = arith.constant 0.000000e+00 : f32
    %32 = vector.broadcast %cst_20 : f32 to vector<8x128xf32>
    %33 = arith.maximumf %31, %32 : vector<8x128xf32>
    %c3 = arith.constant 3 : index
    %c0_21 = arith.constant 0 : index
    %c0_22 = arith.constant 0 : index
    %34 = vector.load %arg2[%c3, %c0_21, %c0_22] : memref<4x144x128xbf16, #tpu.memory_space<vmem>>, vector<1x128x128xbf16>
    %35 = vector.shape_cast %34 : vector<1x128x128xbf16> to vector<128x128xbf16>
    %c3_23 = arith.constant 3 : index
    %c128_24 = arith.constant 128 : index
    %c0_25 = arith.constant 0 : index
    %36 = vector.load %arg2[%c3_23, %c128_24, %c0_25] : memref<4x144x128xbf16, #tpu.memory_space<vmem>>, vector<1x1x128xbf16>
    %37 = vector.shape_cast %36 : vector<1x1x128xbf16> to vector<1x128xbf16>
    %38 = arith.extf %37 : vector<1x128xbf16> to vector<1x128xf32>
    %39 = arith.truncf %33 : vector<8x128xf32> to vector<8x128xbf16>
    %cst_26 = arith.constant dense<0.000000e+00> : vector<8x128xf32>
    %40 = tpu.matmul %39, %35, %cst_26 {dimension_numbers = #tpu.dot_dimension_numbers<[1], [0], [0], [1], [0, 0, 1, 1], [], []>} : vector<8x128xbf16>, vector<128x128xbf16>, vector<8x128xf32> -> vector<8x128xf32>
    %41 = vector.broadcast %38 : vector<1x128xf32> to vector<8x128xf32>
    %42 = arith.addf %40, %41 : vector<8x128xf32>
    %c0_27 = arith.constant 0 : index
    %c0_28 = arith.constant 0 : index
    %43 = vector.load %arg3[%c0_27, %c0_28] : memref<8x128xf32, #tpu.memory_space<vmem>>, vector<8x128xf32>
    tpu.vector_store %arg3[%c0_27, %c0_28], %42 {strides = array<i32>} : memref<8x128xf32, #tpu.memory_space<vmem>>, vector<8x128xf32>,
    return
  }
  func.func @transform_0(%arg0: i32) -> (i32, i32) {
    %c0_i32 = arith.constant 0 : i32
    %c0_i32_0 = arith.constant 0 : i32
    return %arg0, %c0_i32 : i32, i32
  }
  func.func @transform_1(%arg0: i32) -> (i32, i32, i32) {
    %c0_i32 = arith.constant 0 : i32
    %c0_i32_0 = arith.constant 0 : i32
    %c0_i32_1 = arith.constant 0 : i32
    %c0_i32_2 = arith.constant 0 : i32
    return %c0_i32, %c0_i32_0, %c0_i32_1 : i32, i32, i32
  }
  func.func @transform_2(%arg0: i32) -> (i32, i32) {
    %c0_i32 = arith.constant 0 : i32
    %c0_i32_0 = arith.constant 0 : i32
    return %arg0, %c0_i32 : i32, i32
  }
}

</mosaic_0001>

<bundles_post_ra>
// kernel: _lambda_.1
= control target key start
LH: loop header
LB: loop body
LE: loop exit
PB: predicated region body
PF: predicated region fallthrough
CT: control target
= control target key end

     0   :  { %7 = vsyncpa [#allocation3], 0  ;;  %s606_s9 = smov [#allocation2]   ;;  %s683_s0 = inlined_call_operand.vmem [shape: f32[8,16], index: 0, kind: input, shape index: {}]   ;;  %s684_s1 = inlined_call_operand.hbm [shape: bf16[4,144,128], index: 1, kind: input, shape index: {}]   ;;  %s685_s2 = inlined_call_operand.vmem [shape: f32[8,128], index: 2, kind: output, shape index: {}]  }
   0x1   :  { %s15_s10 = sshll.u32 %s606_s9, 4  ;;  %s582_s13 = scalar_lea.hbm %s684_s1, 4608  ;;  %s16_s10 = int_to_ptr.vmem [resolvable:$true] %s15_s10 }
   0x2   :  { %p583_p0 = scmp.ne.s32.totalorder %s684_s1, %s582_s13  ;;  %p586_p1 = scmp.lt.u32.totalorder %s582_s13, %s684_s1 }
   0x4   :  { %p588_p2 = pnand %p586_p1, %p583_p0 }
   0x6   :  { %591 = shalt.err (!%p588_p2)
}
   0x7   :  { %s592_s18 = scalar_lea.vmem %s16_s10, 4608  ;;  %p597_p4 = scmp.lt.s32.totalorder %s16_s10, %s16_s10 }
   0x8   :  { %p593_p3 = scmp.ne.s32.totalorder %s16_s10, %s592_s18  ;;  %p598_p5 = scmp.lt.s32.totalorder %s592_s18, %s592_s18 }
   0xa   :  { %p599_p6 = por %p598_p5, %p597_p4 }
   0xc   :  { %p600_p7 = pnand %p599_p6, %p593_p3 }
   0xe   :  { %603 = shalt.err (!%p600_p7)
}
   0xf   :  { %s607_s19 = smov 64   ;;  %s608_s20 = smov 4  }
  0x10   :  { %21 = dma.hbm_to_vmem [thread:$0]  %s684_s1, 4608, %s16_s10, [#allocation3], %s607_s19, %s607_s19, %s608_s20  }
  0x11   :  { %604 = dma.done.wait [#allocation3], 4608  }
  0x12   :  { %605 = vsyncadd [#allocation3], 4294962688  ;;  %v609_v0 = vmov 0.0   ;;  %vm610_vm0 = vmmov 0   ;;  %v557_v1 = vld [vmem:[#allocation2] sm:$0xff]   ;;  %vm42_vm1 = vcmask 130048   ;;  %v32_v18 = vlaneseq }
  0x13   :  { %486 = vmatprep.subr.bf16.mxu0 %v609_v0  ;;  %488 = vmatprep.mubr.msk.bf16.mxu0 %vm610_vm0, %v609_v0  ;;  %v26_v2 = vld [vmem:[%s683_s0] sm:$0xff]  ;;  %v558_v4 = vld [vmem:[#allocation2 + $0x48] sm:$0xff]   ;;  %v559_v5 = vld [vmem:[#allocation2 + $0x50] sm:$0xff]  }
  0x14   :  { %492 = vmatprep.subr.bf16.mxu1 %v609_v0  ;;  %508 = vmatprep.mubr.msk.bf16.mxu1 %vm610_vm0, %v609_v0  ;;  %v27_v3 = vpack.c.bf16 %v26_v2, %v26_v2  ;;  %v560_v6 = vld [vmem:[#allocation2 + $0x58] sm:$0xff]   ;;  %v561_v7 = vld [vmem:[#allocation2 + $0x60] sm:$0xff]   ;;  %v562_v8 = vld [vmem:[#allocation2 + $0x68] sm:$0xff]   ;;  %v33_v19 = vshrl.u32 %v32_v18, 7 }
  0x15   :  { %487 = vmatpush3.bf16.msra.mxu0 %v557_v1  ;;  %493 = vmatpush3.bf16.msra.mxu1 %v558_v4  ;;  %v563_v9 = vld [vmem:[#allocation2 + $0x70] sm:$0xff]   ;;  %v564_v10 = vld [vmem:[#allocation2 + $0x78] sm:$0xff]   ;;  %v565_v11 = vld [vmem:[#allocation2 + $0x80] sm:$0xff]  }
  0x16   :  { %512 = vmatprep.subr.bf16.mxu0 %v609_v0  ;;  %494 = vmatprep.subr.bf16.mxu1 %v609_v0  ;;  %v566_v12 = vld [vmem:[#allocation2 + $0x90] sm:$0xff]   ;;  %v567_v13 = vld [vmem:[#allocation2 + $0x98] sm:$0xff]   ;;  %v568_v14 = vld [vmem:[#allocation2 + $0xa0] sm:$0xff]   ;;  %v664_v22 = vsub.s32 0, %v33_v19 }
  0x17   :  { %v569_v15 = vld [vmem:[#allocation2 + $0xa8] sm:$0xff]   ;;  %v570_v16 = vld [vmem:[#allocation2 + $0xb0] sm:$0xff]   ;;  %v571_v17 = vld [vmem:[#allocation2 + $0xb8] sm:$0xff]  }
  0x18   :  { %489 = vmatmul.mubr.msk.bf16.vlgmr.msra.gmra.mrb[0].mxu0 %vm42_vm1, %v27_v3  ;;  %v30_v20 = vld [vmem:[#allocation2 + $0x40] sm:$0x1]  ;;  %v573_v32 = vld [vmem:[#allocation2 + $0xc8] sm:$0xff]   ;;  %v574_v33 = vld [vmem:[#allocation2 + $0xd8] sm:$0xff]  }
  0x19   :  { %528 = vmatprep.mubr.msk.bf16.mxu0 %vm610_vm0, %v609_v0  ;;  %495 = vmatpush3.bf16.msra.mxu1 %v559_v5  ;;  %v31_v21 = vunpack.c.l.bf16 %v30_v20  ;;  %v572_v31 = vld [vmem:[#allocation2 + $0xc0] sm:$0xff]   ;;  %v576_v35 = vld [vmem:[#allocation2 + $0xe8] sm:$0xff]   ;;  %v577_v36 = vld [vmem:[#allocation2 + $0xf0] sm:$0xff]  }
  0x1a   :  { %496 = vmatprep.subr.bf16.mxu1 %v609_v0  ;;  %513 = vmatpush3.bf16.msra.mxu0 %v566_v12  ;;  %v575_v34 = vld [vmem:[#allocation2 + $0xe0] sm:$0xff]   ;;  %v578_v37 = vld [vmem:[#allocation2 + $0xf8] sm:$0xff]   ;;  %v104_v39 = vld [vmem:[#allocation2 + $0x88] sm:$0x1] }
  0x1b   :  { %514 = vmatprep.subr.bf16.mxu0 %v609_v0  ;;  %v35_v23 = vrot.slane %v31_v21, %v664_v22  ;;  %v579_v38 = vld [vmem:[#allocation2 + $0x100] sm:$0xff]   ;;  %v105_v40 = vunpack.c.l.bf16 %v104_v39  ;;  %v580_v49 = vld [vmem:[#allocation2 + $0x108] sm:$0xff]   ;;  %v581_v50 = vld [vmem:[#allocation2 + $0x110] sm:$0xff]  }
  0x1c   :  { %v217_v51 = vld [vmem:[#allocation2 + $0xd0] sm:$0x1]  ;;  %v330_v61 = vld [vmem:[#allocation2 + $0x118] sm:$0x1] }
  0x1d   :  { %497 = vmatpush3.bf16.msra.mxu1 %v560_v6  ;;  %v110_v41 = vrot.slane %v105_v40, %v664_v22  ;;  %v218_v52 = vunpack.c.l.bf16 %v217_v51  ;;  %v331_v62 = vunpack.c.l.bf16 %v330_v61 }
  0x1e   :  { %498 = vmatprep.subr.bf16.mxu1 %v609_v0  ;;  %515 = vmatpush3.bf16.msra.mxu0 %v567_v13 }
  0x1f   :  { %516 = vmatprep.subr.bf16.mxu0 %v609_v0  ;;  %v223_v53 = vrot.slane %v218_v52, %v664_v22  ;;  %v336_v63 = vrot.slane %v331_v62, %v664_v22 }
  0x21   :  { %499 = vmatpush3.bf16.msra.mxu1 %v561_v7 }
  0x22   :  { %500 = vmatprep.subr.bf16.mxu1 %v609_v0  ;;  %517 = vmatpush3.bf16.msra.mxu0 %v568_v14 }
  0x23   :  { %518 = vmatprep.subr.bf16.mxu0 %v609_v0 }
  0x25   :  { %501 = vmatpush3.bf16.msra.mxu1 %v562_v8 }
  0x26   :  { %502 = vmatprep.subr.bf16.mxu1 %v609_v0  ;;  %519 = vmatpush3.bf16.msra.mxu0 %v569_v15 }
  0x27   :  { %520 = vmatprep.subr.bf16.mxu0 %v609_v0 }
  0x29   :  { %503 = vmatpush3.bf16.msra.mxu1 %v563_v9 }
  0x2a   :  { %504 = vmatprep.subr.bf16.mxu1 %v609_v0  ;;  %521 = vmatpush3.bf16.msra.mxu0 %v570_v16 }
  0x2b   :  { %522 = vmatprep.subr.bf16.mxu0 %v609_v0 }
  0x2d   :  { %505 = vmatpush3.bf16.msra.mxu1 %v564_v10 }
  0x2e   :  { %506 = vmatprep.subr.bf16.mxu1 %v609_v0  ;;  %523 = vmatpush3.bf16.msra.mxu0 %v571_v17 }
  0x2f   :  { %524 = vmatprep.subr.bf16.mxu0 %v609_v0 }
  0x31   :  { %507 = vmatpush3.bf16.msra.mxu1 %v565_v11 }
  0x32   :  { %532 = vmatprep.subr.bf16.mxu1 %v609_v0  ;;  %525 = vmatpush3.bf16.msra.mxu0 %v572_v31 }
  0x33   :  { %526 = vmatprep.subr.bf16.mxu0 %v609_v0 }
  0x36   :  { %527 = vmatpush3.bf16.msra.mxu0 %v573_v32 }
  0xeb   :  { %v80_v24 = vpop.f32.mrb[0].mxu0 }
  0xec   :  { %v81_v25 = vadd.f32 %v80_v24, %v35_v23  ;;  %v490_v26 = vpop.f32.mrb[1].mxu0 }
  0xed   :  { %v83_v27 = vpop.f32.mrb[2].mxu0 }
  0xee   :  { %v86_v28 = vmax.f32 %v81_v25, 0.0  ;;  %v491_v29 = vpop.f32.mrb[3].mxu0 }
  0xf0   :  { %v106_v30 = vpack.c.bf16 %v86_v28, %v86_v28 }
  0xf2   :  { %509 = vmatmul.mubr.bf16.vlgmr.msra.gmra.mrb[0].mxu1 %v106_v30 }
  0xf3   :  { %548 = vmatprep.mubr.msk.bf16.mxu1 %vm610_vm0, %v609_v0  ;;  %533 = vmatpush3.bf16.msra.mxu1 %v574_v33 }
  0xf4   :  { %534 = vmatprep.subr.bf16.mxu1 %v609_v0 }
  0xf7   :  { %535 = vmatpush3.bf16.msra.mxu1 %v575_v34 }
  0xf8   :  { %536 = vmatprep.subr.bf16.mxu1 %v609_v0 }
  0xfb   :  { %537 = vmatpush3.bf16.msra.mxu1 %v576_v35 }
  0xfc   :  { %538 = vmatprep.subr.bf16.mxu1 %v609_v0 }
  0xff   :  { %539 = vmatpush3.bf16.msra.mxu1 %v577_v36 }
 0x100   :  { %540 = vmatprep.subr.bf16.mxu1 %v609_v0 }
 0x103   :  { %541 = vmatpush3.bf16.msra.mxu1 %v578_v37 }
 0x104   :  { %542 = vmatprep.subr.bf16.mxu1 %v609_v0 }
 0x107   :  { %543 = vmatpush3.bf16.msra.mxu1 %v579_v38 }
 0x108   :  { %544 = vmatprep.subr.bf16.mxu1 %v609_v0 }
 0x10b   :  { %545 = vmatpush3.bf16.msra.mxu1 %v580_v49 }
 0x10c   :  { %546 = vmatprep.subr.bf16.mxu1 %v609_v0 }
 0x10f   :  { %547 = vmatpush3.bf16.msra.mxu1 %v581_v50 }
 0x1c5   :  { %v193_v42 = vpop.f32.mrb[0].mxu1 }
 0x1c6   :  { %v194_v43 = vadd.f32 %v193_v42, %v110_v41  ;;  %v510_v44 = vpop.f32.mrb[1].mxu1 }
 0x1c7   :  { %v196_v45 = vpop.f32.mrb[2].mxu1 }
 0x1c8   :  { %v199_v46 = vmax.f32 %v194_v43, 0.0  ;;  %v511_v47 = vpop.f32.mrb[3].mxu1 }
 0x1ca   :  { %v219_v48 = vpack.c.bf16 %v199_v46, %v199_v46 }
 0x1cc   :  { %529 = vmatmul.mubr.bf16.vlgmr.msra.gmra.mrb[4].mxu0 %v219_v48 }
 0x29f   :  { %v306_v54 = vpop.f32.mrb[4].mxu0 }
 0x2a0   :  { %v307_v55 = vadd.f32 %v306_v54, %v223_v53  ;;  %v530_v56 = vpop.f32.mrb[5].mxu0 }
 0x2a1   :  { %v309_v57 = vpop.f32.mrb[6].mxu0 }
 0x2a2   :  { %v312_v58 = vmax.f32 %v307_v55, 0.0  ;;  %v531_v59 = vpop.f32.mrb[7].mxu0 }
 0x2a4   :  { %v332_v60 = vpack.c.bf16 %v312_v58, %v312_v58 }
 0x2a6   :  { %549 = vmatmul.mubr.bf16.vlgmr.msra.gmra.mrb[4].mxu1 %v332_v60 }
 0x379   :  { %v419_v1 = vpop.f32.mrb[4].mxu1 }
 0x37a   :  { %v420_v0 = vadd.f32 %v419_v1, %v336_v63  ;;  %v550_v2 = vpop.f32.mrb[5].mxu1 }
 0x37b   :  { %v422_v3 = vpop.f32.mrb[6].mxu1 }
 0x37c   :  { %425 = vst [vmem:[%s685_s2] sm:$0xff] %v420_v0  ;;  %v551_v4 = vpop.f32.mrb[7].mxu1 }
 0x37d   :  { %430 = vsyncpa [#allocation3], 1 }

</bundles_post_ra>
